<compile_context>
chip_gen: v6e
topology: v6e:2x2x1
jax: 0.10.0
libtpu: 0.0.40
codegen_flags: <defaults>
</compile_context>

<pallas_src>
import types

import jax
import jax.numpy as jnp
from jax.experimental import pallas as pl
from jax.experimental.pallas import tpu as pltpu


# --------------------------------------------------------------------------
# Pallas kernels
# --------------------------------------------------------------------------
def _matmul_bias_kernel(x_ref, w_ref, b_ref, o_ref):
    # Weights arrive as bf16 (halved HBM traffic); cast activations in-kernel
    # (VPU cast is free-ish) and accumulate on the MXU in f32.
    x = x_ref[...].astype(jnp.bfloat16)
    acc = jnp.dot(x, w_ref[...], preferred_element_type=jnp.float32)
    o_ref[...] = acc + b_ref[...]


def matmul_bias(x, w_bf16, b):
    """(M, K) @ (K, N) + b on the MXU.

    Single grid step: at SegModel sizes the whole (bf16) weight fits VMEM, so
    tiling N would only add ~0.35 us of pipeline overhead per extra step on a
    kernel whose total DMA is tiny."""
    M, K = x.shape
    K2, N = w_bf16.shape
    assert K == K2
    b2 = b.reshape(1, N).astype(jnp.float32)
    return pl.pallas_call(
        _matmul_bias_kernel,
        out_shape=jax.ShapeDtypeStruct((M, N), jnp.float32),
        grid_spec=pltpu.PrefetchScalarGridSpec(
            num_scalar_prefetch=0,
            grid=(1,),
            in_specs=[
                pl.BlockSpec((M, K), lambda i: (0, 0)),
                pl.BlockSpec((K, N), lambda i: (0, 0)),
                pl.BlockSpec((1, N), lambda i: (0, 0)),
            ],
            out_specs=pl.BlockSpec((M, N), lambda i: (0, 0)),
        ),
        compiler_params=pltpu.CompilerParams(dimension_semantics=("arbitrary",)),
    )(x, w_bf16, b2)


def _sigmoid(x):
    return 1.0 / (1.0 + jnp.exp(-x))


def _gen_epilogue_kernel(raw_ref, sem_ref, hard_ref, cen_ref, off_ref,
                         edge_ref, den_ref, ent_ref, scond_ref, hcond_ref):
    # raw block: (1, OC, HW) — channels on sublanes, spatial HW on lanes.
    raw = raw_ref[0]                                   # (OC, HW)
    C = sem_ref.shape[1]
    HW = raw.shape[1]
    logits = raw[:C]                                   # (C, HW)

    # channel softmax (sublane-axis reductions, lane-dense vregs)
    m = jnp.max(logits, axis=0, keepdims=True)
    e = jnp.exp(logits - m)
    p = e / jnp.sum(e, axis=0, keepdims=True)
    sem_ref[0] = p

    # max_sampler (hard): one-hot of channel argmax, first-match tie-break so
    # exact ties match torch argmax semantics (single-hot).
    pmax = jnp.max(p, axis=0, keepdims=True)                       # (1, HW)
    ch = jax.lax.broadcasted_iota(jnp.float32, (C, HW), 0)         # (C, HW)
    first = jnp.min(jnp.where(p == pmax, ch, jnp.float32(C)),
                    axis=0, keepdims=True)                         # (1, HW)
    hard = (ch == first).astype(jnp.float32)
    hard_ref[0] = hard

    # per-pixel entropy -> (1, HW): lane-dense (unmasked) store.
    ent_ref[0] = -jnp.sum(p * jnp.log(p + 1e-5), axis=0, keepdims=True)

    # spatial means (semantic-condition recovery), soft and discretized.
    inv_hw = jnp.float32(1.0 / HW)
    scond_ref[0] = jnp.sum(p, axis=1, keepdims=True) * inv_hw      # (C, 1)
    hcond_ref[0] = jnp.sum(hard, axis=1, keepdims=True) * inv_hw   # (C, 1)

    # remaining generator heads (EUP transcendentals, fused with the stats pass)
    cen_ref[0] = _sigmoid(raw[C:C + 1])
    off_ref[0] = jnp.tanh(raw[C + 1:C + 3])
    edge_ref[0] = _sigmoid(raw[C + 3:C + 4])
    den_ref[0] = _sigmoid(raw[C + 4:C + 5])


def gen_epilogue_and_stats(raw, num_semantics):
    """raw: (B, OC, HW) f32 generator output (channel-major, NCHW-compatible).

    Fused softmax / sigmoid / tanh epilogue + max-sampler discretization +
    per-pixel entropy + spatial-mean condition recovery, all in a (C, HW)
    layout with HW on the lane axis.  No wrapper transposes needed."""
    B, OC, HW = raw.shape
    C = num_semantics
    assert OC == C + 5
    # TODO(synk): for large resolutions (e.g. HW >= 64K, C ~ 35) tile HW with a
    # grid and accumulate scond/hcond via pl.when init/finalize to stay within
    # v7x's smaller VMEM; unnecessary at these sizes.
    out_shapes = (
        jax.ShapeDtypeStruct((B, C, HW), jnp.float32),   # soft sem_seg
        jax.ShapeDtypeStruct((B, C, HW), jnp.float32),   # hard one-hot
        jax.ShapeDtypeStruct((B, 1, HW), jnp.float32),   # ins_center
        jax.ShapeDtypeStruct((B, 2, HW), jnp.float32),   # ins_offset
        jax.ShapeDtypeStruct((B, 1, HW), jnp.float32),   # ins_edge
        jax.ShapeDtypeStruct((B, 1, HW), jnp.float32),   # ins_density
        jax.ShapeDtypeStruct((B, 1, HW), jnp.float32),   # entropy
        jax.ShapeDtypeStruct((B, C, 1), jnp.float32),    # soft sem cond
        jax.ShapeDtypeStruct((B, C, 1), jnp.float32),    # hard sem cond
    )
    out_specs = (
        pl.BlockSpec((1, C, HW), lambda b: (b, 0, 0)),
        pl.BlockSpec((1, C, HW), lambda b: (b, 0, 0)),
        pl.BlockSpec((1, 1, HW), lambda b: (b, 0, 0)),
        pl.BlockSpec((1, 2, HW), lambda b: (b, 0, 0)),
        pl.BlockSpec((1, 1, HW), lambda b: (b, 0, 0)),
        pl.BlockSpec((1, 1, HW), lambda b: (b, 0, 0)),
        pl.BlockSpec((1, 1, HW), lambda b: (b, 0, 0)),
        pl.BlockSpec((1, C, 1), lambda b: (b, 0, 0)),
        pl.BlockSpec((1, C, 1), lambda b: (b, 0, 0)),
    )
    return pl.pallas_call(
        _gen_epilogue_kernel,
        out_shape=out_shapes,
        grid_spec=pltpu.PrefetchScalarGridSpec(
            num_scalar_prefetch=0,
            grid=(B,),
            in_specs=[pl.BlockSpec((1, OC, HW), lambda b: (b, 0, 0))],
            out_specs=out_specs,
        ),
        compiler_params=pltpu.CompilerParams(dimension_semantics=("parallel",)),
    )(raw)


# --------------------------------------------------------------------------
# Glue: losses and the SegModel forward
# --------------------------------------------------------------------------
def _kl_div_batchmean(log_q, p):
    # F.kl_div(input=log_q, target=p, reduction='batchmean')
    term = jnp.where(p > 0, p * (jnp.log(jnp.where(p > 0, p, 1.0)) - log_q), 0.0)
    return jnp.sum(term) / p.shape[0]


class SegModelPallas:
    def __init__(self, opt):
        self.opt = opt
        key = jax.random.PRNGKey(0)
        kg, kd = jax.random.split(key)
        C, H = opt.num_semantics, opt.seg_dim
        self._out_ch = C + 5  # sem + center + offset(2) + edge + density
        g_in = opt.z_dim + C
        g_out = self._out_ch * H * H
        # TODO(synk): the real ProGANGenerator / ProGANDiscriminator are external
        # progressive-GAN networks; replaced by deterministic single-layer heads.
        self.w_g = (jax.random.normal(kg, (g_in, g_out), jnp.float32) * 0.05
                    ).astype(jnp.bfloat16)
        self.b_g = jnp.zeros((g_out,), jnp.float32)
        d_in = C * H * H
        self.w_d = (jax.random.normal(kd, (d_in, 128), jnp.float32) * 0.02
                    ).astype(jnp.bfloat16)
        self.b_d = jnp.zeros((128,), jnp.float32)

    # --- synthetic netG (+ fused discretize/stats) and netD ----------------
    def _generate(self, z, cond):
        """netG forward with the activation epilogue, max-sampler
        discretization, entropy and condition-recovery stats fused into a
        single Pallas pass over the raw generator output."""
        B = z.shape[0]
        C, H = self.opt.num_semantics, self.opt.seg_dim
        HW = H * H
        g_in = jnp.concatenate([z, cond['sem_cond']], axis=1)
        raw = matmul_bias(g_in, self.w_g, self.b_g)        # (B, OC*HW) f32
        raw3 = raw.reshape(B, self._out_ch, HW)            # free (row-major) reshape

        (sem, hard, cen, off, edge, den, ent, scond, hcond) = \
            gen_epilogue_and_stats(raw3, C)

        as_img = lambda t: t.reshape(B, t.shape[1], H, H)  # free reshapes (no transpose)
        fake_seg = {
            'sem_seg': as_img(sem),
            'ins_center': as_img(cen),
            'ins_offset': as_img(off),
            'ins_edge': as_img(edge),
            'ins_density': as_img(den),
            'raw_sem_seg': raw3[:, :C].reshape(B, C, H, H),
        }
        if self.opt.discretization == 'max':
            # TODO(synk): straight-through estimator (custom_vjp) needed for
            # training-time gradients; forward value matches max_sampler.
            x_sem = as_img(hard)
        elif self.opt.discretization == 'none':
            x_sem = fake_seg['sem_seg']
        else:
            # TODO(synk): gumbel sampler (needs in-kernel PRNG); fall back to max.
            x_sem = as_img(hard)
        # TODO(synk): InstanceRefiner.filter_offset / filter_density are external;
        # offsets/density passed through unfiltered.
        x_fake_seg = {'sem_seg': x_sem,
                      'ins_center': fake_seg['ins_center'],
                      'ins_offset': fake_seg['ins_offset'],
                      'ins_edge': fake_seg['ins_edge'],
                      'ins_density': fake_seg['ins_density']}
        stats = {'entropy': as_img(ent),
                 'fake_sem_cond': scond.reshape(B, C),
                 'd_fake_sem_cond': hcond.reshape(B, C)}
        return fake_seg, x_fake_seg, stats

    def _netD(self, sem_seg_nchw, sem_cond=None):
        B = sem_seg_nchw.shape[0]
        out = matmul_bias(sem_seg_nchw.reshape(B, -1), self.w_d, self.b_d)
        return out[:, :1]                                  # (B, 1) score

    # --- SegModel helpers ---------------------------------------------------
    def preprocess_input(self, data, is_fake=False):
        if not data:
            return None, None, None
        # dim == seg_dim so no resize; TODO(synk): nearest/bilinear resize path.
        z = data.get('z_seg')
        seg = {k: data.get(k) for k in
               ('sem_seg', 'ins_center', 'ins_offset', 'ins_edge', 'ins_density')}
        cond = {'sem_cond': data.get('sem_cond'), 'ins_cond': data.get('ins_cond')}
        return z, seg, cond

    def postprocess_output(self, seg):
        # dim == seg_dim -> identity.  TODO(synk): interpolate + bilimax path.
        return seg

    # --- losses ---------------------------------------------------------------
    def compute_generator_loss(self, real_cond, z, hard=True):
        fake_seg, x_fake_seg, stats = self._generate(z, real_cond)
        score = self._netD(x_fake_seg['sem_seg'])
        loss_gen = jnp.sum(-score)                 # WGAN generator loss, summed
        loss = loss_gen
        loss_sem_entropy = jnp.mean(stats['entropy'])
        cond_loss = 0.0
        if self.opt.cond_seg in ('semantic', 'panoptic'):
            real_sem_cond = real_cond['sem_cond']
            kl = _kl_div_batchmean(jnp.log(stats['fake_sem_cond'] + 1e-5),
                                   real_sem_cond)
            kl_d = _kl_div_batchmean(jnp.log(stats['d_fake_sem_cond'] + 1e-5),
                                     real_sem_cond)
            del kl_d  # logged only in the reference implementation
            if 'sem_recover' in self.opt.cond_mode:
                cond_loss = cond_loss + kl
        if 'entropy' in self.opt.cond_mode:
            cond_loss = cond_loss + loss_sem_entropy
        loss = loss + cond_loss
        # TODO(synk): pseudo_supervision branch requires InstanceRefiner.batch_transform.
        out = x_fake_seg if hard else fake_seg
        return loss, out

    def compute_discriminator_loss(self, real_cond, real_seg, fake_seg):
        real = real_seg['sem_seg']
        fake = fake_seg['sem_seg']
        Br, Bf = real.shape[0], fake.shape[0]
        # Fused: one matmul over [real; fake] so the 1 MB discriminator weight
        # is DMA'd from HBM once, and MXU row utilization doubles.
        both = jnp.concatenate([real.reshape(Br, -1), fake.reshape(Bf, -1)], axis=0)
        scores = matmul_bias(both, self.w_d, self.b_d)[:, :1]
        real_score, fake_score = scores[:Br], scores[Br:]
        # TODO(synk): ImprovedWGANLoss gradient penalty needs autodiff through the
        # Pallas discriminator kernel; only the Wasserstein term is computed.
        return jnp.mean(fake_score) - jnp.mean(real_score)

    def generate_fake(self, real_cond, z, hard=True):
        fake_seg, x_fake_seg, _ = self._generate(z, real_cond)
        return x_fake_seg if hard else fake_seg

    # --- forward --------------------------------------------------------------
    def forward(self, data, fake_data=None, mode='', hard=True):
        fake_data = fake_data or {}
        z, real_seg, real_cond = self.preprocess_input(data)
        _, fake_seg, _ = self.preprocess_input(fake_data, is_fake=True)
        if mode == 'generator':
            g_loss, out_seg = self.compute_generator_loss(real_cond, z, hard=hard)
            return g_loss, self.postprocess_output(out_seg)
        elif mode == 'discriminator':
            return self.compute_discriminator_loss(real_cond, real_seg, fake_seg)
        elif mode == 'inference':
            return self.postprocess_output(self.generate_fake(real_cond, z, hard=hard))
        else:
            raise ValueError(f"mode '{mode}' is invalid")


# --------------------------------------------------------------------------
# Demo
# --------------------------------------------------------------------------
if __name__ == "__main__":
    opt = types.SimpleNamespace(
        dim=16, seg_dim=16, aspect_ratio=1.0, num_semantics=16, z_dim=32,
        discretization='max', cond_seg='semantic', cond_mode='sem_recover entropy',
        instance_type='center_offset', panoptic=False, pseudo_supervision=False,
        store_masks=False, t=1.0, bilimax=False, ova_idx=[],
    )
    B, C, H, Z = 2, opt.num_semantics, opt.seg_dim, opt.z_dim

    key = jax.random.PRNGKey(0)
    ks = jax.random.split(key, 8)
    data = {
        'z_seg': jax.random.normal(ks[0], (B, Z), jnp.float32),
        'sem_seg': jax.nn.softmax(jax.random.normal(ks[1], (B, C, H, H)), axis=1),
        'ins_center': jax.nn.sigmoid(jax.random.normal(ks[2], (B, 1, H, H))),
        'ins_offset': jnp.tanh(jax.random.normal(ks[3], (B, 2, H, H))),
        'ins_edge': jax.nn.sigmoid(jax.random.normal(ks[4], (B, 1, H, H))),
        'ins_density': jax.nn.sigmoid(jax.random.normal(ks[5], (B, 1, H, H))),
        'sem_cond': jax.nn.softmax(jax.random.normal(ks[6], (B, C)), axis=1),
        'ins_cond': jnp.abs(jax.random.normal(ks[7], (B, 1))),
    }

    model = SegModelPallas(opt)

    # inference mode
    fake_seg = model.forward(data, mode='inference')
    jax.block_until_ready(fake_seg['sem_seg'])

    # generator mode
    g_loss, gen_seg = model.forward(data, mode='generator')
    jax.block_until_ready(g_loss)

    # discriminator mode (use the generated segmentation as the fake sample)
    fake_data = dict(data)
    fake_data.update({k: fake_seg[k] for k in
                      ('sem_seg', 'ins_center', 'ins_offset', 'ins_edge', 'ins_density')})
    d_loss = model.forward(data, fake_data=fake_data, mode='discriminator')
    jax.block_until_ready(d_loss)

    assert gen_seg['sem_seg'].shape == (B, C, H, H)
    # hard one-hot must sum to 1 over channels everywhere (single-hot, no ties)
    assert jnp.allclose(jnp.sum(fake_seg['sem_seg'], axis=1), 1.0)
    assert jnp.isfinite(g_loss) and jnp.isfinite(d_loss)
    print("KERNEL_OK")
</pallas_src>

<mosaic_0001>
module attributes {stable_mosaic.version = 11 : i64} {
  func.func @_matmul_bias_kernel(%arg0: i32, %arg1: memref<2x48xf32, #tpu.memory_space<vmem>>, %arg2: memref<48x5376xbf16, #tpu.memory_space<vmem>>, %arg3: memref<1x5376xf32, #tpu.memory_space<vmem>>, %arg4: memref<2x5376xf32, #tpu.memory_space<vmem>>) attributes {dimension_semantics = [#tpu.dimension_semantics<arbitrary>], iteration_bounds = array<i64: 1>, scalar_prefetch = 0 : i64, scratch_operands = 0 : i64, tpu.core_type = #tpu.core_type<tc>, window_params = [{pipeline_mode = #tpu.pipeline_mode<synchronous>, transform_indices = @transform_0, window_bounds = array<i64: 2, 48>}, {pipeline_mode = #tpu.pipeline_mode<synchronous>, transform_indices = @transform_1, window_bounds = array<i64: 48, 5376>}, {pipeline_mode = #tpu.pipeline_mode<synchronous>, transform_indices = @transform_2, window_bounds = array<i64: 1, 5376>}, {pipeline_mode = #tpu.pipeline_mode<synchronous>, transform_indices = @transform_3, window_bounds = array<i64: 2, 5376>}]} {
    %c0 = arith.constant 0 : index
    %c0_0 = arith.constant 0 : index
    %0 = vector.load %arg1[%c0, %c0_0] : memref<2x48xf32, #tpu.memory_space<vmem>>, vector<2x48xf32>
    %1 = arith.truncf %0 : vector<2x48xf32> to vector<2x48xbf16>
    %c0_1 = arith.constant 0 : index
    %c0_2 = arith.constant 0 : index
    %2 = vector.load %arg2[%c0_1, %c0_2] : memref<48x5376xbf16, #tpu.memory_space<vmem>>, vector<48x5376xbf16>
    %cst = arith.constant dense<0.000000e+00> : vector<2x5376xf32>
    %3 = tpu.matmul %1, %2, %cst {dimension_numbers = #tpu.dot_dimension_numbers<[1], [0], [0], [1], [0, 0, 1, 1], [], []>} : vector<2x48xbf16>, vector<48x5376xbf16>, vector<2x5376xf32> -> vector<2x5376xf32>
    %c0_3 = arith.constant 0 : index
    %c0_4 = arith.constant 0 : index
    %4 = vector.load %arg3[%c0_3, %c0_4] : memref<1x5376xf32, #tpu.memory_space<vmem>>, vector<1x5376xf32>
    %5 = vector.broadcast %4 : vector<1x5376xf32> to vector<2x5376xf32>
    %6 = arith.addf %3, %5 : vector<2x5376xf32>
    %c0_5 = arith.constant 0 : index
    %c0_6 = arith.constant 0 : index
    %7 = vector.load %arg4[%c0_5, %c0_6] : memref<2x5376xf32, #tpu.memory_space<vmem>>, vector<2x5376xf32>
    tpu.vector_store %arg4[%c0_5, %c0_6], %6 {strides = array<i32>} : memref<2x5376xf32, #tpu.memory_space<vmem>>, vector<2x5376xf32>,
    return
  }
  func.func @transform_0(%arg0: i32) -> (i32, i32) {
    %c0_i32 = arith.constant 0 : i32
    %c0_i32_0 = arith.constant 0 : i32
    %c0_i32_1 = arith.constant 0 : i32
    return %c0_i32, %c0_i32_0 : i32, i32
  }
  func.func @transform_1(%arg0: i32) -> (i32, i32) {
    %c0_i32 = arith.constant 0 : i32
    %c0_i32_0 = arith.constant 0 : i32
    %c0_i32_1 = arith.constant 0 : i32
    return %c0_i32, %c0_i32_0 : i32, i32
  }
  func.func @transform_2(%arg0: i32) -> (i32, i32) {
    %c0_i32 = arith.constant 0 : i32
    %c0_i32_0 = arith.constant 0 : i32
    %c0_i32_1 = arith.constant 0 : i32
    return %c0_i32, %c0_i32_0 : i32, i32
  }
  func.func @transform_3(%arg0: i32) -> (i32, i32) {
    %c0_i32 = arith.constant 0 : i32
    %c0_i32_0 = arith.constant 0 : i32
    %c0_i32_1 = arith.constant 0 : i32
    return %c0_i32, %c0_i32_0 : i32, i32
  }
}

</mosaic_0001>

<bundles_post_ra>
// kernel: tpu_custom_call.1
= control target key start
LH: loop header
LB: loop body
LE: loop exit
PB: predicated region body
PF: predicated region fallthrough
CT: control target
= control target key end

     0   :  { %8 = vsyncpa [#allocation3], 0  ;;  %s2772_s0 = inlined_call_operand.hbm [shape: f32[2,48], index: 0, kind: input, shape index: {}]   ;;  %s2773_s1 = inlined_call_operand.hbm [shape: bf16[48,5376], index: 1, kind: input, shape index: {}]   ;;  %s2774_s2 = inlined_call_operand.hbm [shape: f32[1,5376], index: 2, kind: input, shape index: {}]   ;;  %s2775_s3 = inlined_call_operand.hbm [shape: f32[2,5376], index: 3, kind: output, shape index: {}]  }
   0x1   :  { %9 = vsyncpa [#allocation6], 0 }
   0x2   :  { %10 = vsyncpa [#allocation4], 0  ;;  %s2587_s12 = smov [#allocation5]  }
   0x3   :  { %s26_s13 = sshll.u32 %s2587_s12, 4  ;;  %s27_s13 = int_to_ptr.vmem [resolvable:$true] %s26_s13 }
   0x4   :  { %s2509_s14 = scalar_lea.vmem %s27_s13, 16128  ;;  %p2514_p1 = scmp.lt.s32.totalorder %s27_s13, %s27_s13 }
   0x5   :  { %p2510_p0 = scmp.ne.s32.totalorder %s27_s13, %s2509_s14  ;;  %p2515_p2 = scmp.lt.s32.totalorder %s2509_s14, %s2509_s14 }
   0x7   :  { %p2516_p3 = por %p2515_p2, %p2514_p1 }
   0x9   :  { %p2517_p4 = pnand %p2516_p3, %p2510_p0 }
   0xb   :  { %2520 = shalt.err (!%p2517_p4)
}
   0xc   :  { %s2588_s15 = smov 2688   ;;  %s2589_s16 = smov 168  }
   0xd   :  { %32 = dma.hbm_to_vmem [thread:$0]  %s2773_s1, 16128, %s27_s13, [#allocation6], %s2588_s15, %s2588_s15, %s2589_s16  }
   0xe   :  { %s2590_s19 = smov [#allocation2]   ;;  %s2591_s21 = smov [#allocation7]  }
   0xf   :  { %s17_s20 = sshll.u32 %s2590_s19, 4  ;;  %s39_s22 = sshll.u32 %s2591_s21, 4  ;;  %s18_s20 = int_to_ptr.vmem [resolvable:$true] %s17_s20  ;;  %s40_s22 = int_to_ptr.vmem [resolvable:$true] %s39_s22 }
  0x10   :  { %s2529_s23 = scalar_lea.vmem %s18_s20, 32  ;;  %p2534_p6 = scmp.lt.s32.totalorder %s18_s20, %s18_s20 }
  0x11   :  { %p2530_p5 = scmp.ne.s32.totalorder %s18_s20, %s2529_s23  ;;  %p2535_p7 = scmp.lt.s32.totalorder %s2529_s23, %s2529_s23 }
  0x13   :  { %p2536_p8 = por %p2535_p7, %p2534_p6 }
  0x15   :  { %p2537_p9 = pnand %p2536_p8, %p2530_p5 }
  0x17   :  { %2540 = shalt.err (!%p2537_p9)
}
  0x18   :  { %20 = dma.hbm_to_vmem [thread:$0]  %s2772_s0, 32, %s18_s20, [#allocation3]  }
  0x19   :  { %s2549_s26 = scalar_lea.vmem %s40_s22, 672  ;;  %p2554_p11 = scmp.lt.s32.totalorder %s40_s22, %s40_s22 }
  0x1a   :  { %p2550_p10 = scmp.ne.s32.totalorder %s40_s22, %s2549_s26  ;;  %p2555_p12 = scmp.lt.s32.totalorder %s2549_s26, %s2549_s26 }
  0x1c   :  { %p2556_p13 = por %p2555_p12, %p2554_p11 }
  0x1e   :  { %p2557_p0 = pnand %p2556_p13, %p2550_p10 }
  0x20   :  { %2560 = shalt.err (!%p2557_p0)
}
  0x21   :  { %42 = dma.hbm_to_vmem [thread:$0]  %s2774_s2, 672, %s40_s22, [#allocation6]  }
  0x22   :  { %2581 = dma.done.wait [#allocation3], 32  }
  0x23   :  { %2582 = vsyncadd [#allocation3], 4294967264 }
  0x24   :  { %2583 = dma.done.wait [#allocation6], 16800  }
  0x25   :  { %2584 = vsyncadd [#allocation6], 4294950496  ;;  %v2592_v0 = vmov 0   ;;  %v2312_v1 = vld [vmem:[#allocation5 + $0x2a4] ss:$168 sps:$4 sm:$0xff]   ;;  %vm1033_vm0 = vcmask 392192  }
  0x26   :  { %1069 = vmatprep.mubr.bf16.mxu0 %v2592_v0  ;;  %1110 = vmatprep.mubr.bf16.mxu1 %v2592_v0  ;;  %v2314_v2 = vld [vmem:[#allocation5 + $0x2ac] ss:$168 sps:$4 sm:$0xff]   ;;  %v2316_v3 = vld [vmem:[#allocation5 + $0x2a0] ss:$168 sps:$4 sm:$0xff]   ;;  %v2320_v6 = vld [vmem:[#allocation5 + $0x15c] ss:$168 sps:$4 sm:$0xff]  }
  0x27   :  { %1047 = vmatprep.subr.bf16.mxu0 %v2312_v1  ;;  %v2317_v4 = vld [vmem:[#allocation5 + $0x2a8] ss:$168 sps:$4 sm:$0xff]   ;;  %1088 = vmatprep.subr.bf16.mxu1 %v2314_v2  ;;  %v2318_v5 = vld [vmem:[#allocation5 + $0x154] ss:$168 sps:$4 sm:$0xff]   ;;  %v2323_v8 = vld [vmem:[#allocation5 + $0x158] ss:$168 sps:$4 sm:$0xff]  }
  0x28   :  { %1048 = vmatpush1.bf16.msra.mxu0 %v2316_v3  ;;  %1089 = vmatpush1.bf16.msra.mxu1 %v2317_v4  ;;  %v2322_v7 = vld [vmem:[#allocation5 + $0x150] ss:$168 sps:$4 sm:$0xff]   ;;  %v2324_v9 = vld [vmem:[#allocation5 + $0x4] ss:$168 sps:$4 sm:$0xff]   ;;  %v2328_v11 = vld [vmem:[#allocation5] ss:$168 sps:$4 sm:$0xff]  }
  0x29   :  { %1049 = vmatprep.subr.bf16.mxu0 %v2318_v5  ;;  %1090 = vmatprep.subr.bf16.mxu1 %v2320_v6  ;;  %v2326_v10 = vld [vmem:[#allocation5 + $0xc] ss:$168 sps:$4 sm:$0xff]   ;;  %v2329_v12 = vld [vmem:[#allocation5 + $0x8] ss:$168 sps:$4 sm:$0xff]   ;;  %v53_v13 = vld [vmem:[#allocation2] sm:$0x3] }
  0x2a   :  { %v2332_v14 = vld [vmem:[#allocation5 + $0x2b4] ss:$168 sps:$4 sm:$0xff]   ;;  %v2626_v16 = vpack.c.bf16 %v53_v13, %v53_v13  ;;  %v2330_v17 = vld [vmem:[#allocation5 + $0x2b0] ss:$168 sps:$4 sm:$0xff]   ;;  %v2338_v19 = vld [vmem:[#allocation5 + $0x164] ss:$168 sps:$4 sm:$0xff]  }
  0x2b   :  { %v2335_v15 = vld [vmem:[#allocation5 + $0x2bc] ss:$168 sps:$4 sm:$0xff]   ;;  %v2333_v18 = vld [vmem:[#allocation5 + $0x2b8] ss:$168 sps:$4 sm:$0xff]   ;;  %v2341_v20 = vld [vmem:[#allocation5 + $0x16c] ss:$168 sps:$4 sm:$0xff]  }
  0x2c   :  { %1050 = vmatpush1.bf16.msra.mxu0 %v2322_v7  ;;  %1091 = vmatpush1.bf16.msra.mxu1 %v2323_v8  ;;  %v2336_v21 = vld [vmem:[#allocation5 + $0x160] ss:$168 sps:$4 sm:$0xff]   ;;  %v2344_v23 = vld [vmem:[#allocation5 + $0x14] ss:$168 sps:$4 sm:$0xff]   ;;  %v2342_v25 = vld [vmem:[#allocation5 + $0x10] ss:$168 sps:$4 sm:$0xff]  }
  0x2d   :  { %1051 = vmatprep.subr.bf16.mxu0 %v2324_v9  ;;  %1092 = vmatprep.subr.bf16.mxu1 %v2326_v10  ;;  %v2339_v22 = vld [vmem:[#allocation5 + $0x168] ss:$168 sps:$4 sm:$0xff]   ;;  %v2347_v24 = vld [vmem:[#allocation5 + $0x1c] ss:$168 sps:$4 sm:$0xff]   ;;  %v2345_v26 = vld [vmem:[#allocation5 + $0x18] ss:$168 sps:$4 sm:$0xff]  }
  0x2e   :  { %v2350_v27 = vld [vmem:[#allocation5 + $0x2c4] ss:$168 sps:$4 sm:$0xff]   ;;  %v2348_v29 = vld [vmem:[#allocation5 + $0x2c0] ss:$168 sps:$4 sm:$0xff]   ;;  %v2356_v31 = vld [vmem:[#allocation5 + $0x174] ss:$168 sps:$4 sm:$0xff]  }
  0x2f   :  { %v2353_v28 = vld [vmem:[#allocation5 + $0x2cc] ss:$168 sps:$4 sm:$0xff]   ;;  %v2351_v30 = vld [vmem:[#allocation5 + $0x2c8] ss:$168 sps:$4 sm:$0xff]   ;;  %v2359_v32 = vld [vmem:[#allocation5 + $0x17c] ss:$168 sps:$4 sm:$0xff]  }
  0x30   :  { %1052 = vmatpush1.bf16.msra.mxu0 %v2328_v11  ;;  %1093 = vmatpush1.bf16.msra.mxu1 %v2329_v12  ;;  %v2354_v33 = vld [vmem:[#allocation5 + $0x170] ss:$168 sps:$4 sm:$0xff]   ;;  %v2362_v35 = vld [vmem:[#allocation5 + $0x24] ss:$168 sps:$4 sm:$0xff]   ;;  %v2360_v37 = vld [vmem:[#allocation5 + $0x20] ss:$168 sps:$4 sm:$0xff]  }
  0x31   :  { %1129 = vmatprep.subr.bf16.mxu0 %v2332_v14  ;;  %1170 = vmatprep.subr.bf16.mxu1 %v2335_v15  ;;  %v2357_v34 = vld [vmem:[#allocation5 + $0x178] ss:$168 sps:$4 sm:$0xff]   ;;  %v2365_v36 = vld [vmem:[#allocation5 + $0x2c] ss:$168 sps:$4 sm:$0xff]   ;;  %v2363_v38 = vld [vmem:[#allocation5 + $0x28] ss:$168 sps:$4 sm:$0xff]  }
  0x32   :  { %v2368_v39 = vld [vmem:[#allocation5 + $0x2d4] ss:$168 sps:$4 sm:$0xff]   ;;  %v2366_v41 = vld [vmem:[#allocation5 + $0x2d0] ss:$168 sps:$4 sm:$0xff]   ;;  %v2374_v43 = vld [vmem:[#allocation5 + $0x184] ss:$168 sps:$4 sm:$0xff]  }
  0x33   :  { %2282 = vmatmul.mubr.msk.bf16.vlgmr.msra.gmra.mxu0 %vm1033_vm0, %v2626_v16  ;;  %2283 = vmatmul.mubr.msk.bf16.vlgmr.msra.gmra.mxu1 %vm1033_vm0, %v2626_v16  ;;  %v2371_v40 = vld [vmem:[#allocation5 + $0x2dc] ss:$168 sps:$4 sm:$0xff]   ;;  %v2369_v42 = vld [vmem:[#allocation5 + $0x2d8] ss:$168 sps:$4 sm:$0xff]   ;;  %v2377_v44 = vld [vmem:[#allocation5 + $0x18c] ss:$168 sps:$4 sm:$0xff]  }
  0x34   :  { %1130 = vmatpush1.bf16.msra.mxu0 %v2330_v17  ;;  %1171 = vmatpush1.bf16.msra.mxu1 %v2333_v18  ;;  %v2372_v45 = vld [vmem:[#allocation5 + $0x180] ss:$168 sps:$4 sm:$0xff]   ;;  %v2380_v47 = vld [vmem:[#allocation5 + $0x34] ss:$168 sps:$4 sm:$0xff]   ;;  %v2378_v49 = vld [vmem:[#allocation5 + $0x30] ss:$168 sps:$4 sm:$0xff]  }
  0x35   :  { %1131 = vmatprep.subr.bf16.mxu0 %v2338_v19  ;;  %1172 = vmatprep.subr.bf16.mxu1 %v2341_v20  ;;  %v2375_v46 = vld [vmem:[#allocation5 + $0x188] ss:$168 sps:$4 sm:$0xff]   ;;  %v2383_v48 = vld [vmem:[#allocation5 + $0x3c] ss:$168 sps:$4 sm:$0xff]   ;;  %v2381_v50 = vld [vmem:[#allocation5 + $0x38] ss:$168 sps:$4 sm:$0xff]  }
  0x36   :  { %1151 = vmatprep.mubr.bf16.mxu0 %v2592_v0  ;;  %1192 = vmatprep.mubr.bf16.mxu1 %v2592_v0  ;;  %v2386_v51 = vld [vmem:[#allocation5 + $0x2e4] ss:$168 sps:$4 sm:$0xff]   ;;  %v2384_v53 = vld [vmem:[#allocation5 + $0x2e0] ss:$168 sps:$4 sm:$0xff]   ;;  %v2392_v55 = vld [vmem:[#allocation5 + $0x194] ss:$168 sps:$4 sm:$0xff]  }
  0x37   :  { %v2389_v52 = vld [vmem:[#allocation5 + $0x2ec] ss:$168 sps:$4 sm:$0xff]   ;;  %v2387_v54 = vld [vmem:[#allocation5 + $0x2e8] ss:$168 sps:$4 sm:$0xff]   ;;  %v2395_v56 = vld [vmem:[#allocation5 + $0x19c] ss:$168 sps:$4 sm:$0xff]  }
  0x38   :  { %1132 = vmatpush1.bf16.msra.mxu0 %v2336_v21  ;;  %1173 = vmatpush1.bf16.msra.mxu1 %v2339_v22  ;;  %v2390_v57 = vld [vmem:[#allocation5 + $0x190] ss:$168 sps:$4 sm:$0xff]   ;;  %v2398_v59 = vld [vmem:[#allocation5 + $0x44] ss:$168 sps:$4 sm:$0xff]   ;;  %v2396_v61 = vld [vmem:[#allocation5 + $0x40] ss:$168 sps:$4 sm:$0xff]  }
  0x39   :  { %1133 = vmatprep.subr.bf16.mxu0 %v2344_v23  ;;  %1174 = vmatprep.subr.bf16.mxu1 %v2347_v24  ;;  %v2393_v58 = vld [vmem:[#allocation5 + $0x198] ss:$168 sps:$4 sm:$0xff]   ;;  %v2401_v60 = vld [vmem:[#allocation5 + $0x4c] ss:$168 sps:$4 sm:$0xff]   ;;  %v2399_v62 = vld [vmem:[#allocation5 + $0x48] ss:$168 sps:$4 sm:$0xff]  }
  0x3a   :  { %v2404_v63 = vld [vmem:[#allocation5 + $0x2f4] ss:$168 sps:$4 sm:$0xff]   ;;  %v2402_v2 = vld [vmem:[#allocation5 + $0x2f0] ss:$168 sps:$4 sm:$0xff]   ;;  %v2410_v4 = vld [vmem:[#allocation5 + $0x1a4] ss:$168 sps:$4 sm:$0xff]  }
  0x3b   :  { %v2407_v1 = vld [vmem:[#allocation5 + $0x2fc] ss:$168 sps:$4 sm:$0xff]   ;;  %v2405_v3 = vld [vmem:[#allocation5 + $0x2f8] ss:$168 sps:$4 sm:$0xff]   ;;  %v2413_v5 = vld [vmem:[#allocation5 + $0x1ac] ss:$168 sps:$4 sm:$0xff]  }
  0x3c   :  { %1134 = vmatpush1.bf16.msra.mxu0 %v2342_v25  ;;  %1175 = vmatpush1.bf16.msra.mxu1 %v2345_v26  ;;  %v2408_v6 = vld [vmem:[#allocation5 + $0x1a0] ss:$168 sps:$4 sm:$0xff]   ;;  %v2416_v8 = vld [vmem:[#allocation5 + $0x54] ss:$168 sps:$4 sm:$0xff]   ;;  %v2414_v10 = vld [vmem:[#allocation5 + $0x50] ss:$168 sps:$4 sm:$0xff]  }
  0x3d   :  { %1211 = vmatprep.subr.bf16.mxu0 %v2350_v27  ;;  %1252 = vmatprep.subr.bf16.mxu1 %v2353_v28  ;;  %v2411_v7 = vld [vmem:[#allocation5 + $0x1a8] ss:$168 sps:$4 sm:$0xff]   ;;  %v2419_v9 = vld [vmem:[#allocation5 + $0x5c] ss:$168 sps:$4 sm:$0xff]   ;;  %v2417_v11 = vld [vmem:[#allocation5 + $0x58] ss:$168 sps:$4 sm:$0xff]  }
  0x3e   :  { %v2422_v12 = vld [vmem:[#allocation5 + $0x304] ss:$168 sps:$4 sm:$0xff]   ;;  %v2420_v14 = vld [vmem:[#allocation5 + $0x300] ss:$168 sps:$4 sm:$0xff]   ;;  %v2428_v17 = vld [vmem:[#allocation5 + $0x1b4] ss:$168 sps:$4 sm:$0xff]  }
  0x3f   :  { %2284 = vmatmul.mubr.msk.bf16.vlgmr.msra.gmra.mxu0 %vm1033_vm0, %v2626_v16  ;;  %2285 = vmatmul.mubr.msk.bf16.vlgmr.msra.gmra.mxu1 %vm1033_vm0, %v2626_v16  ;;  %v2425_v13 = vld [vmem:[#allocation5 + $0x30c] ss:$168 sps:$4 sm:$0xff]   ;;  %v2423_v15 = vld [vmem:[#allocation5 + $0x308] ss:$168 sps:$4 sm:$0xff]   ;;  %v2431_v18 = vld [vmem:[#allocation5 + $0x1bc] ss:$168 sps:$4 sm:$0xff]  }
  0x40   :  { %1212 = vmatpush1.bf16.msra.mxu0 %v2348_v29  ;;  %1253 = vmatpush1.bf16.msra.mxu1 %v2351_v30  ;;  %v2426_v19 = vld [vmem:[#allocation5 + $0x1b0] ss:$168 sps:$4 sm:$0xff]   ;;  %v2434_v21 = vld [vmem:[#allocation5 + $0x64] ss:$168 sps:$4 sm:$0xff]   ;;  %v2432_v23 = vld [vmem:[#allocation5 + $0x60] ss:$168 sps:$4 sm:$0xff]  }
  0x41   :  { %1213 = vmatprep.subr.bf16.mxu0 %v2356_v31  ;;  %1254 = vmatprep.subr.bf16.mxu1 %v2359_v32  ;;  %v2429_v20 = vld [vmem:[#allocation5 + $0x1b8] ss:$168 sps:$4 sm:$0xff]   ;;  %v2437_v22 = vld [vmem:[#allocation5 + $0x6c] ss:$168 sps:$4 sm:$0xff]   ;;  %v2435_v24 = vld [vmem:[#allocation5 + $0x68] ss:$168 sps:$4 sm:$0xff]  }
  0x42   :  { %1233 = vmatprep.mubr.bf16.mxu0 %v2592_v0  ;;  %1274 = vmatprep.mubr.bf16.mxu1 %v2592_v0  ;;  %v2440_v25 = vld [vmem:[#allocation5 + $0x314] ss:$168 sps:$4 sm:$0xff]   ;;  %v2438_v27 = vld [vmem:[#allocation5 + $0x310] ss:$168 sps:$4 sm:$0xff]   ;;  %v2446_v29 = vld [vmem:[#allocation5 + $0x1c4] ss:$168 sps:$4 sm:$0xff]  }
  0x43   :  { %v2443_v26 = vld [vmem:[#allocation5 + $0x31c] ss:$168 sps:$4 sm:$0xff]   ;;  %v2441_v28 = vld [vmem:[#allocation5 + $0x318] ss:$168 sps:$4 sm:$0xff]   ;;  %v2449_v30 = vld [vmem:[#allocation5 + $0x1cc] ss:$168 sps:$4 sm:$0xff]  }
  0x44   :  { %1214 = vmatpush1.bf16.msra.mxu0 %v2354_v33  ;;  %1255 = vmatpush1.bf16.msra.mxu1 %v2357_v34  ;;  %v2444_v31 = vld [vmem:[#allocation5 + $0x1c0] ss:$168 sps:$4 sm:$0xff]   ;;  %v2452_v33 = vld [vmem:[#allocation5 + $0x74] ss:$168 sps:$4 sm:$0xff]   ;;  %s2594_s0 = smov [#allocation8]  }
  0x45   :  { %1215 = vmatprep.subr.bf16.mxu0 %v2362_v35  ;;  %1256 = vmatprep.subr.bf16.mxu1 %v2365_v36  ;;  %v2447_v32 = vld [vmem:[#allocation5 + $0x1c8] ss:$168 sps:$4 sm:$0xff]   ;;  %v2455_v34 = vld [vmem:[#allocation5 + $0x7c] ss:$168 sps:$4 sm:$0xff]   ;;  %v2453_v36 = vld [vmem:[#allocation5 + $0x78] ss:$168 sps:$4 sm:$0xff]  }
  0x46   :  { %v2450_v35 = vld [vmem:[#allocation5 + $0x70] ss:$168 sps:$4 sm:$0xff]   ;;  %s2146_s2 = sshll.u32 %s2594_s0, 4  ;;  %s2147_s2 = int_to_ptr.vmem [resolvable:$true] %s2146_s2 }
  0x47   :  { %s2561_s28 = scalar_lea.vmem %s2147_s2, 1344  ;;  %p2566_p2 = scmp.lt.s32.totalorder %s2147_s2, %s2147_s2 }
  0x48   :  { %1216 = vmatpush1.bf16.msra.mxu0 %v2360_v37  ;;  %1257 = vmatpush1.bf16.msra.mxu1 %v2363_v38  ;;  %v2458_v37 = vld [vmem:[#allocation5 + $0x324] ss:$168 sps:$4 sm:$0xff]   ;;  %p2562_p1 = scmp.ne.s32.totalorder %s2147_s2, %s2561_s28  ;;  %p2567_p3 = scmp.lt.s32.totalorder %s2561_s28, %s2561_s28 }
  0x49   :  { %1293 = vmatprep.subr.bf16.mxu0 %v2368_v39  ;;  %1334 = vmatprep.subr.bf16.mxu1 %v2371_v40  ;;  %v2461_v38 = vld [vmem:[#allocation5 + $0x32c] ss:$168 sps:$4 sm:$0xff]   ;;  %v2456_v39 = vld [vmem:[#allocation5 + $0x320] ss:$168 sps:$4 sm:$0xff]  }
  0x4a   :  { %v2459_v40 = vld [vmem:[#allocation5 + $0x328] ss:$168 sps:$4 sm:$0xff]   ;;  %p2568_p4 = por %p2567_p3, %p2566_p2 }
  0x4b   :  { %2286 = vmatmul.mubr.msk.bf16.vlgmr.msra.gmra.mxu0 %vm1033_vm0, %v2626_v16  ;;  %2287 = vmatmul.mubr.msk.bf16.vlgmr.msra.gmra.mxu1 %vm1033_vm0, %v2626_v16 }
  0x4c   :  { %1294 = vmatpush1.bf16.msra.mxu0 %v2366_v41  ;;  %1335 = vmatpush1.bf16.msra.mxu1 %v2369_v42  ;;  %v2464_v41 = vld [vmem:[#allocation5 + $0x1d4] ss:$168 sps:$4 sm:$0xff]   ;;  %p2569_p5 = pnand %p2568_p4, %p2562_p1 }
  0x4d   :  { %1295 = vmatprep.subr.bf16.mxu0 %v2374_v43  ;;  %1336 = vmatprep.subr.bf16.mxu1 %v2377_v44  ;;  %v2467_v42 = vld [vmem:[#allocation5 + $0x1dc] ss:$168 sps:$4 sm:$0xff]   ;;  %v2462_v43 = vld [vmem:[#allocation5 + $0x1d0] ss:$168 sps:$4 sm:$0xff]  }
  0x4e   :  { %1315 = vmatprep.mubr.bf16.mxu0 %v2592_v0  ;;  %1356 = vmatprep.mubr.bf16.mxu1 %v2592_v0  ;;  %v2465_v44 = vld [vmem:[#allocation5 + $0x1d8] ss:$168 sps:$4 sm:$0xff]  }
  0x50   :  { %1296 = vmatpush1.bf16.msra.mxu0 %v2372_v45  ;;  %1337 = vmatpush1.bf16.msra.mxu1 %v2375_v46  ;;  %v2470_v45 = vld [vmem:[#allocation5 + $0x84] ss:$168 sps:$4 sm:$0xff]  }
  0x51   :  { %1297 = vmatprep.subr.bf16.mxu0 %v2380_v47  ;;  %1338 = vmatprep.subr.bf16.mxu1 %v2383_v48  ;;  %v2473_v46 = vld [vmem:[#allocation5 + $0x8c] ss:$168 sps:$4 sm:$0xff]   ;;  %v2468_v47 = vld [vmem:[#allocation5 + $0x80] ss:$168 sps:$4 sm:$0xff]  }
  0x52   :  { %v2471_v48 = vld [vmem:[#allocation5 + $0x88] ss:$168 sps:$4 sm:$0xff]  }
  0x54   :  { %1298 = vmatpush1.bf16.msra.mxu0 %v2378_v49  ;;  %1339 = vmatpush1.bf16.msra.mxu1 %v2381_v50  ;;  %v2476_v49 = vld [vmem:[#allocation5 + $0x334] ss:$168 sps:$4 sm:$0xff]  }
  0x55   :  { %1375 = vmatprep.subr.bf16.mxu0 %v2386_v51  ;;  %1416 = vmatprep.subr.bf16.mxu1 %v2389_v52  ;;  %v2479_v50 = vld [vmem:[#allocation5 + $0x33c] ss:$168 sps:$4 sm:$0xff]   ;;  %v2474_v51 = vld [vmem:[#allocation5 + $0x330] ss:$168 sps:$4 sm:$0xff]  }
  0x56   :  { %v2477_v52 = vld [vmem:[#allocation5 + $0x338] ss:$168 sps:$4 sm:$0xff]  }
  0x57   :  { %2288 = vmatmul.mubr.msk.bf16.vlgmr.msra.gmra.mxu0 %vm1033_vm0, %v2626_v16  ;;  %2289 = vmatmul.mubr.msk.bf16.vlgmr.msra.gmra.mxu1 %vm1033_vm0, %v2626_v16 }
  0x58   :  { %1376 = vmatpush1.bf16.msra.mxu0 %v2384_v53  ;;  %1417 = vmatpush1.bf16.msra.mxu1 %v2387_v54  ;;  %v2482_v53 = vld [vmem:[#allocation5 + $0x1e4] ss:$168 sps:$4 sm:$0xff]  }
  0x59   :  { %1377 = vmatprep.subr.bf16.mxu0 %v2392_v55  ;;  %1418 = vmatprep.subr.bf16.mxu1 %v2395_v56  ;;  %v2485_v54 = vld [vmem:[#allocation5 + $0x1ec] ss:$168 sps:$4 sm:$0xff]   ;;  %v2480_v55 = vld [vmem:[#allocation5 + $0x1e0] ss:$168 sps:$4 sm:$0xff]  }
  0x5a   :  { %1397 = vmatprep.mubr.bf16.mxu0 %v2592_v0  ;;  %1438 = vmatprep.mubr.bf16.mxu1 %v2592_v0  ;;  %v2483_v56 = vld [vmem:[#allocation5 + $0x1e8] ss:$168 sps:$4 sm:$0xff]  }
  0x5c   :  { %1378 = vmatpush1.bf16.msra.mxu0 %v2390_v57  ;;  %1419 = vmatpush1.bf16.msra.mxu1 %v2393_v58  ;;  %v2488_v57 = vld [vmem:[#allocation5 + $0x94] ss:$168 sps:$4 sm:$0xff]  }
  0x5d   :  { %1379 = vmatprep.subr.bf16.mxu0 %v2398_v59  ;;  %1420 = vmatprep.subr.bf16.mxu1 %v2401_v60  ;;  %v2491_v58 = vld [vmem:[#allocation5 + $0x9c] ss:$168 sps:$4 sm:$0xff]   ;;  %v2486_v59 = vld [vmem:[#allocation5 + $0x90] ss:$168 sps:$4 sm:$0xff]  }
  0x5e   :  { %v2489_v60 = vld [vmem:[#allocation5 + $0x98] ss:$168 sps:$4 sm:$0xff]  }
  0x60   :  { %1380 = vmatpush1.bf16.msra.mxu0 %v2396_v61  ;;  %1421 = vmatpush1.bf16.msra.mxu1 %v2399_v62  ;;  %v2494_v61 = vld [vmem:[#allocation5 + $0x344] ss:$168 sps:$4 sm:$0xff]   ;;  %v2492_v62 = vld [vmem:[#allocation5 + $0x340] ss:$168 sps:$4 sm:$0xff]  }
  0x61   :  { %1457 = vmatprep.subr.bf16.mxu0 %v2404_v63  ;;  %1498 = vmatprep.subr.bf16.mxu1 %v2407_v1  ;;  %v2497_v63 = vld [vmem:[#allocation5 + $0x1f4] ss:$168 sps:$4 sm:$0xff]   ;;  %v2495_v1 = vld [vmem:[#allocation5 + $0x1f0] ss:$168 sps:$4 sm:$0xff]  }
  0x63   :  { %2290 = vmatmul.mubr.msk.bf16.vlgmr.msra.gmra.mxu0 %vm1033_vm0, %v2626_v16  ;;  %2291 = vmatmul.mubr.msk.bf16.vlgmr.msra.gmra.mxu1 %vm1033_vm0, %v2626_v16 }
  0x64   :  { %1458 = vmatpush1.bf16.msra.mxu0 %v2402_v2  ;;  %1499 = vmatpush1.bf16.msra.mxu1 %v2405_v3  ;;  %v2500_v2 = vld [vmem:[#allocation5 + $0xa4] ss:$168 sps:$4 sm:$0xff]   ;;  %v2498_v3 = vld [vmem:[#allocation5 + $0xa0] ss:$168 sps:$4 sm:$0xff]  }
  0x65   :  { %1459 = vmatprep.subr.bf16.mxu0 %v2410_v4  ;;  %1500 = vmatprep.subr.bf16.mxu1 %v2413_v5  ;;  %v193_v4 = vlaneseq }
  0x66   :  { %1479 = vmatprep.mubr.bf16.mxu0 %v2592_v0  ;;  %1520 = vmatprep.mubr.bf16.mxu1 %v2592_v0 }
  0x67   :  { %v194_v5 = vshrl.u32 %v193_v4, 7 }
  0x68   :  { %1460 = vmatpush1.bf16.msra.mxu0 %v2408_v6  ;;  %1501 = vmatpush1.bf16.msra.mxu1 %v2411_v7 }
  0x69   :  { %1461 = vmatprep.subr.bf16.mxu0 %v2416_v8  ;;  %1502 = vmatprep.subr.bf16.mxu1 %v2419_v9  ;;  %v2689_v6 = vsub.s32 0, %v194_v5  ;;  %v2691_v7 = vsub.s32 2, %v194_v5  ;;  %v181_v8 = vld [vmem:[#allocation7] sm:$0xff]  ;;  %v2693_v9 = vsub.s32 1, %v194_v5 }
  0x6c   :  { %1462 = vmatpush1.bf16.msra.mxu0 %v2414_v10  ;;  %1503 = vmatpush1.bf16.msra.mxu1 %v2417_v11  ;;  %v2593_v10 = vmov 1983009808   ;;  %v2695_v11 = vsub.s32 3, %v194_v5 }
  0x6d   :  { %1539 = vmatprep.subr.bf16.mxu0 %v2422_v12  ;;  %1580 = vmatprep.subr.bf16.mxu1 %v2425_v13  ;;  %v196_v12 = vrot.slane %v181_v8, %v2689_v6  ;;  %v204_v13 = vrot.slane %v181_v8, %v2691_v7 }
  0x6f   :  { %2292 = vmatmul.mubr.msk.bf16.vlgmr.msra.gmra.mxu0 %vm1033_vm0, %v2626_v16  ;;  %2293 = vmatmul.mubr.msk.bf16.vlgmr.msra.gmra.mxu1 %vm1033_vm0, %v2626_v16 }
  0x70   :  { %1540 = vmatpush1.bf16.msra.mxu0 %v2420_v14  ;;  %1581 = vmatpush1.bf16.msra.mxu1 %v2423_v15  ;;  %v200_v14 = vrot.slane %v181_v8, %v2693_v9  ;;  %v208_v15 = vrot.slane %v181_v8, %v2695_v11 }
  0x71   :  { %1541 = vmatprep.subr.bf16.mxu0 %v2428_v17  ;;  %1582 = vmatprep.subr.bf16.mxu1 %v2431_v18 }
  0x72   :  { %1561 = vmatprep.mubr.bf16.mxu0 %v2592_v0  ;;  %1602 = vmatprep.mubr.bf16.mxu1 %v2592_v0 }
  0x74   :  { %1542 = vmatpush1.bf16.msra.mxu0 %v2426_v19  ;;  %1583 = vmatpush1.bf16.msra.mxu1 %v2429_v20 }
  0x75   :  { %1543 = vmatprep.subr.bf16.mxu0 %v2434_v21  ;;  %1584 = vmatprep.subr.bf16.mxu1 %v2437_v22 }
  0x78   :  { %1544 = vmatpush1.bf16.msra.mxu0 %v2432_v23  ;;  %1585 = vmatpush1.bf16.msra.mxu1 %v2435_v24 }
  0x79   :  { %1621 = vmatprep.subr.bf16.mxu0 %v2440_v25  ;;  %1662 = vmatprep.subr.bf16.mxu1 %v2443_v26 }
  0x7b   :  { %2294 = vmatmul.mubr.msk.bf16.vlgmr.msra.gmra.mxu0 %vm1033_vm0, %v2626_v16  ;;  %2295 = vmatmul.mubr.msk.bf16.vlgmr.msra.gmra.mxu1 %vm1033_vm0, %v2626_v16 }
  0x7c   :  { %1622 = vmatpush1.bf16.msra.mxu0 %v2438_v27  ;;  %1663 = vmatpush1.bf16.msra.mxu1 %v2441_v28 }
  0x7d   :  { %1623 = vmatprep.subr.bf16.mxu0 %v2446_v29  ;;  %1664 = vmatprep.subr.bf16.mxu1 %v2449_v30  ;;  %v2703_v30 = vsub.s32 4, %v194_v5 }
  0x7e   :  { %1643 = vmatprep.mubr.bf16.mxu0 %v2592_v0  ;;  %1684 = vmatprep.mubr.bf16.mxu1 %v2592_v0 }
  0x80   :  { %1624 = vmatpush1.bf16.msra.mxu0 %v2444_v31  ;;  %1665 = vmatpush1.bf16.msra.mxu1 %v2447_v32  ;;  %v2705_v31 = vsub.s32 6, %v194_v5 }
  0x81   :  { %1625 = vmatprep.subr.bf16.mxu0 %v2452_v33  ;;  %1666 = vmatprep.subr.bf16.mxu1 %v2455_v34 }
  0x84   :  { %1626 = vmatpush1.bf16.msra.mxu0 %v2450_v35  ;;  %1667 = vmatpush1.bf16.msra.mxu1 %v2453_v36  ;;  %v2709_v36 = vsub.s32 5, %v194_v5 }
  0x85   :  { %1703 = vmatprep.subr.bf16.mxu0 %v2458_v37  ;;  %1744 = vmatprep.subr.bf16.mxu1 %v2461_v38  ;;  %v2711_v37 = vsub.s32 7, %v194_v5 }
  0x87   :  { %2296 = vmatmul.mubr.msk.bf16.vlgmr.msra.gmra.mxu0 %vm1033_vm0, %v2626_v16  ;;  %2297 = vmatmul.mubr.msk.bf16.vlgmr.msra.gmra.mxu1 %vm1033_vm0, %v2626_v16 }
  0x88   :  { %1704 = vmatpush1.bf16.msra.mxu0 %v2456_v39  ;;  %1745 = vmatpush1.bf16.msra.mxu1 %v2459_v40  ;;  %v212_v39 = vrot.slane %v181_v8, %v2703_v30  ;;  %v220_v40 = vrot.slane %v181_v8, %v2705_v31 }
  0x89   :  { %1705 = vmatprep.subr.bf16.mxu0 %v2464_v41  ;;  %1746 = vmatprep.subr.bf16.mxu1 %v2467_v42  ;;  %v216_v41 = vrot.slane %v181_v8, %v2709_v36  ;;  %v224_v42 = vrot.slane %v181_v8, %v2711_v37 }
  0x8a   :  { %1725 = vmatprep.mubr.bf16.mxu0 %v2592_v0  ;;  %1766 = vmatprep.mubr.bf16.mxu1 %v2592_v0 }
  0x8c   :  { %1706 = vmatpush1.bf16.msra.mxu0 %v2462_v43  ;;  %1747 = vmatpush1.bf16.msra.mxu1 %v2465_v44 }
  0x8d   :  { %1707 = vmatprep.subr.bf16.mxu0 %v2470_v45  ;;  %1748 = vmatprep.subr.bf16.mxu1 %v2473_v46 }
  0x90   :  { %1708 = vmatpush1.bf16.msra.mxu0 %v2468_v47  ;;  %1749 = vmatpush1.bf16.msra.mxu1 %v2471_v48 }
  0x91   :  { %1785 = vmatprep.subr.bf16.mxu0 %v2476_v49  ;;  %1826 = vmatprep.subr.bf16.mxu1 %v2479_v50 }
  0x93   :  { %2298 = vmatmul.mubr.msk.bf16.vlgmr.msra.gmra.mxu0 %vm1033_vm0, %v2626_v16  ;;  %2299 = vmatmul.mubr.msk.bf16.vlgmr.msra.gmra.mxu1 %vm1033_vm0, %v2626_v16 }
  0x94   :  { %1786 = vmatpush1.bf16.msra.mxu0 %v2474_v51  ;;  %1827 = vmatpush1.bf16.msra.mxu1 %v2477_v52 }
  0x95   :  { %1787 = vmatprep.subr.bf16.mxu0 %v2482_v53  ;;  %1828 = vmatprep.subr.bf16.mxu1 %v2485_v54 }
  0x96   :  { %1807 = vmatprep.mubr.bf16.mxu0 %v2592_v0  ;;  %1848 = vmatprep.mubr.bf16.mxu1 %v2592_v0 }
  0x98   :  { %1788 = vmatpush1.bf16.msra.mxu0 %v2480_v55  ;;  %1829 = vmatpush1.bf16.msra.mxu1 %v2483_v56 }
  0x99   :  { %1789 = vmatprep.subr.bf16.mxu0 %v2488_v57  ;;  %1830 = vmatprep.subr.bf16.mxu1 %v2491_v58  ;;  %v182_v57 = vld [vmem:[#allocation7 + $0x8] sm:$0xff] }
  0x9c   :  { %1790 = vmatpush1.bf16.msra.mxu0 %v2486_v59  ;;  %1831 = vmatpush1.bf16.msra.mxu1 %v2489_v60 }
  0x9d   :  { %1867 = vmatprep.subr.bf16.mxu0 %v2494_v61  ;;  %v228_v61 = vrot.slane %v182_v57, %v2689_v6 }
  0x9f   :  { %2300 = vmatmul.mubr.msk.bf16.vlgmr.msra.gmra.mxu0 %vm1033_vm0, %v2626_v16  ;;  %2301 = vmatmul.mubr.msk.bf16.vlgmr.msra.gmra.mxu1 %vm1033_vm0, %v2626_v16 }
  0xa0   :  { %1868 = vmatpush1.bf16.msra.mxu0 %v2492_v62  ;;  %1889 = vmatprep.mubr.bf16.mxu0 %v2592_v0  ;;  %v1943_v0 = vunpack.c.l.s4 %v2593_v10  ;;  %v236_v62 = vrot.slane %v182_v57, %v2691_v7 }
  0xa1   :  { %1869 = vmatprep.subr.bf16.mxu0 %v2497_v63  ;;  %v232_v63 = vrot.slane %v182_v57, %v2693_v9 }
  0xa4   :  { %1870 = vmatpush1.bf16.msra.mxu0 %v2495_v1  ;;  %v240_v1 = vrot.slane %v182_v57, %v2695_v11 }
  0xa5   :  { %1871 = vmatprep.subr.bf16.mxu0 %v2500_v2 }
  0xa8   :  { %1872 = vmatpush1.bf16.msra.mxu0 %v2498_v3 }
  0xab   :  { %2302 = vmatmul.mubr.msk.bf16.vlgmr.msra.gmra.mxu0 %vm1033_vm0, %v2626_v16  ;;  %v1944_v16 = vunpack.c.0.s8 %v1943_v0 }
  0xad   :  { %v2701_v24 = vsub.s32 %v1944_v16, %v194_v5 }
  0xf3   :  { %v1071_v17 = vpop.f32.mrf.mxu0  ;;  %v1112_v18 = vpop.f32.mrf.mxu1 }
  0xf4   :  { %v1072_v19 = vadd.f32 %v1071_v17, %v196_v12  ;;  %v1113_v20 = vadd.f32 %v1112_v18, %v204_v13 }
  0xf5   :  { %v1073_v21 = vpop.f32.mrf.mxu0  ;;  %v1114_v22 = vpop.f32.mrf.mxu1 }
  0xf6   :  { %v1074_v23 = vadd.f32 %v1073_v21, %v200_v14  ;;  %v1115_v25 = vadd.f32 %v1114_v22, %v208_v15  ;;  %v244_v22 = vrot.slane %v182_v57, %v2703_v30 }
  0xf7   :  { %v1075_v26 = vpop.f32.mrf.mxu0  ;;  %v1116_v27 = vpop.f32.mrf.mxu1 }
  0xf8   :  { %v1940_v28 = vcombine.low %v1072_v19, %v1074_v23  ;;  %v1941_v29 = vcombine.low %v1113_v20, %v1115_v25  ;;  %v252_v23 = vrot.slane %v182_v57, %v2705_v31  ;;  %v248_v25 = vrot.slane %v182_v57, %v2709_v36 }
  0xf9   :  { %v1076_v32 = vpop.f32.mrf.mxu0  ;;  %v1117_v33 = vpop.f32.mrf.mxu1  ;;  %v256_v26 = vrot.slane %v182_v57, %v2711_v37 }
  0xfa   :  { %v1948_v34 = vrot.slane %v1940_v28, %v2701_v24  ;;  %v1955_v35 = vrot.slane %v1941_v29, %v2701_v24 }
  0xfc   :  { %v1956_v38 = vcombine.low %v1948_v34, %v1955_v35 }
  0xfe   :  { %2129 = vst [vmem:[#allocation8] sm:$0xff] %v1956_v38 }
  0xff   :  { %v1153_v43 = vpop.f32.mrf.mxu0  ;;  %v1194_v44 = vpop.f32.mrf.mxu1 }
 0x100   :  { %v1154_v45 = vadd.f32 %v1153_v43, %v212_v39  ;;  %v1195_v46 = vadd.f32 %v1194_v44, %v220_v40 }
 0x101   :  { %v1155_v47 = vpop.f32.mrf.mxu0  ;;  %v1196_v48 = vpop.f32.mrf.mxu1 }
 0x102   :  { %v1156_v49 = vadd.f32 %v1155_v47, %v216_v41  ;;  %v1197_v50 = vadd.f32 %v1196_v48, %v224_v42 }
 0x103   :  { %v1157_v51 = vpop.f32.mrf.mxu0  ;;  %v1198_v52 = vpop.f32.mrf.mxu1 }
 0x104   :  { %v1957_v53 = vcombine.low %v1154_v45, %v1156_v49  ;;  %v1958_v54 = vcombine.low %v1195_v46, %v1197_v50  ;;  %v183_v45 = vld [vmem:[#allocation7 + $0x10] sm:$0xff] }
 0x105   :  { %v1158_v55 = vpop.f32.mrf.mxu0  ;;  %v1199_v56 = vpop.f32.mrf.mxu1  ;;  %v260_v49 = vrot.slane %v183_v45, %v2689_v6  ;;  %v268_v50 = vrot.slane %v183_v45, %v2691_v7  ;;  %v264_v51 = vrot.slane %v183_v45, %v2693_v9  ;;  %v272_v52 = vrot.slane %v183_v45, %v2695_v11 }
 0x106   :  { %v1965_v58 = vrot.slane %v1957_v53, %v2701_v24  ;;  %v1972_v59 = vrot.slane %v1958_v54, %v2701_v24 }
 0x108   :  { %v1973_v60 = vcombine.low %v1965_v58, %v1972_v59 }
 0x10a   :  { %2130 = vst [vmem:[#allocation8 + $0x8] sm:$0xff] %v1973_v60 }
 0x10b   :  { %v1235_v2 = vpop.f32.mrf.mxu0  ;;  %v1276_v3 = vpop.f32.mrf.mxu1 }
 0x10c   :  { %v1236_v4 = vadd.f32 %v1235_v2, %v228_v61  ;;  %v1277_v5 = vadd.f32 %v1276_v3, %v236_v62 }
 0x10d   :  { %v1237_v8 = vpop.f32.mrf.mxu0  ;;  %v1278_v10 = vpop.f32.mrf.mxu1 }
 0x10e   :  { %v1238_v0 = vadd.f32 %v1237_v8, %v232_v63  ;;  %v1279_v12 = vadd.f32 %v1278_v10, %v240_v1  ;;  %v276_v10 = vrot.slane %v183_v45, %v2703_v30 }
 0x10f   :  { %v1239_v13 = vpop.f32.mrf.mxu0  ;;  %v1280_v14 = vpop.f32.mrf.mxu1 }
 0x110   :  { %v1974_v16 = vcombine.low %v1236_v4, %v1238_v0  ;;  %v1975_v15 = vcombine.low %v1277_v5, %v1279_v12  ;;  %v284_v0 = vrot.slane %v183_v45, %v2705_v31  ;;  %v280_v12 = vrot.slane %v183_v45, %v2709_v36 }
 0x111   :  { %v1240_v17 = vpop.f32.mrf.mxu0  ;;  %v1281_v18 = vpop.f32.mrf.mxu1  ;;  %v288_v13 = vrot.slane %v183_v45, %v2711_v37 }
 0x112   :  { %v1982_v19 = vrot.slane %v1974_v16, %v2701_v24  ;;  %v1989_v20 = vrot.slane %v1975_v15, %v2701_v24 }
 0x114   :  { %v1990_v21 = vcombine.low %v1982_v19, %v1989_v20 }
 0x116   :  { %2131 = vst [vmem:[#allocation8 + $0x10] sm:$0xff] %v1990_v21 }
 0x117   :  { %v1317_v27 = vpop.f32.mrf.mxu0  ;;  %v1358_v28 = vpop.f32.mrf.mxu1 }
 0x118   :  { %v1318_v29 = vadd.f32 %v1317_v27, %v244_v22  ;;  %v1359_v32 = vadd.f32 %v1358_v28, %v252_v23 }
 0x119   :  { %v1319_v33 = vpop.f32.mrf.mxu0  ;;  %v1360_v34 = vpop.f32.mrf.mxu1 }
 0x11a   :  { %v1320_v35 = vadd.f32 %v1319_v33, %v248_v25  ;;  %v1361_v38 = vadd.f32 %v1360_v34, %v256_v26 }
 0x11b   :  { %v1321_v39 = vpop.f32.mrf.mxu0  ;;  %v1362_v40 = vpop.f32.mrf.mxu1 }
 0x11c   :  { %v1991_v41 = vcombine.low %v1318_v29, %v1320_v35  ;;  %v1992_v42 = vcombine.low %v1359_v32, %v1361_v38  ;;  %v184_v29 = vld [vmem:[#allocation7 + $0x18] sm:$0xff] }
 0x11d   :  { %v1322_v43 = vpop.f32.mrf.mxu0  ;;  %v1363_v44 = vpop.f32.mrf.mxu1  ;;  %v292_v35 = vrot.slane %v184_v29, %v2689_v6  ;;  %v300_v38 = vrot.slane %v184_v29, %v2691_v7  ;;  %v296_v39 = vrot.slane %v184_v29, %v2693_v9  ;;  %v304_v40 = vrot.slane %v184_v29, %v2695_v11 }
 0x11e   :  { %v1999_v46 = vrot.slane %v1991_v41, %v2701_v24  ;;  %v2006_v47 = vrot.slane %v1992_v42, %v2701_v24 }
 0x120   :  { %v2007_v48 = vcombine.low %v1999_v46, %v2006_v47 }
 0x122   :  { %2132 = vst [vmem:[#allocation8 + $0x18] sm:$0xff] %v2007_v48 }
 0x123   :  { %v1399_v53 = vpop.f32.mrf.mxu0  ;;  %v1440_v54 = vpop.f32.mrf.mxu1 }
 0x124   :  { %v1400_v55 = vadd.f32 %v1399_v53, %v260_v49  ;;  %v1441_v56 = vadd.f32 %v1440_v54, %v268_v50 }
 0x125   :  { %v1401_v57 = vpop.f32.mrf.mxu0  ;;  %v1442_v58 = vpop.f32.mrf.mxu1 }
 0x126   :  { %v1402_v59 = vadd.f32 %v1401_v57, %v264_v51  ;;  %v1443_v60 = vadd.f32 %v1442_v58, %v272_v52  ;;  %v308_v58 = vrot.slane %v184_v29, %v2703_v30 }
 0x127   :  { %v1403_v61 = vpop.f32.mrf.mxu0  ;;  %v1444_v62 = vpop.f32.mrf.mxu1 }
 0x128   :  { %v2008_v63 = vcombine.low %v1400_v55, %v1402_v59  ;;  %v2009_v1 = vcombine.low %v1441_v56, %v1443_v60  ;;  %v316_v59 = vrot.slane %v184_v29, %v2705_v31  ;;  %v312_v60 = vrot.slane %v184_v29, %v2709_v36 }
 0x129   :  { %v1404_v2 = vpop.f32.mrf.mxu0  ;;  %v1445_v3 = vpop.f32.mrf.mxu1  ;;  %v320_v61 = vrot.slane %v184_v29, %v2711_v37 }
 0x12a   :  { %v2016_v4 = vrot.slane %v2008_v63, %v2701_v24  ;;  %v2023_v5 = vrot.slane %v2009_v1, %v2701_v24 }
 0x12c   :  { %v2024_v8 = vcombine.low %v2016_v4, %v2023_v5 }
 0x12e   :  { %2133 = vst [vmem:[#allocation8 + $0x20] sm:$0xff] %v2024_v8 }
 0x12f   :  { %v1481_v14 = vpop.f32.mrf.mxu0  ;;  %v1522_v16 = vpop.f32.mrf.mxu1 }
 0x130   :  { %v1482_v15 = vadd.f32 %v1481_v14, %v276_v10  ;;  %v1523_v17 = vadd.f32 %v1522_v16, %v284_v0 }
 0x131   :  { %v1483_v18 = vpop.f32.mrf.mxu0  ;;  %v1524_v19 = vpop.f32.mrf.mxu1 }
 0x132   :  { %v1484_v20 = vadd.f32 %v1483_v18, %v280_v12  ;;  %v1525_v21 = vadd.f32 %v1524_v19, %v288_v13 }
 0x133   :  { %v1485_v22 = vpop.f32.mrf.mxu0  ;;  %v1526_v23 = vpop.f32.mrf.mxu1 }
 0x134   :  { %v2025_v25 = vcombine.low %v1482_v15, %v1484_v20  ;;  %v2026_v26 = vcombine.low %v1523_v17, %v1525_v21  ;;  %v185_v15 = vld [vmem:[#allocation7 + $0x20] sm:$0xff] }
 0x135   :  { %v1486_v27 = vpop.f32.mrf.mxu0  ;;  %v1527_v28 = vpop.f32.mrf.mxu1  ;;  %v324_v20 = vrot.slane %v185_v15, %v2689_v6  ;;  %v332_v21 = vrot.slane %v185_v15, %v2691_v7  ;;  %v328_v22 = vrot.slane %v185_v15, %v2693_v9  ;;  %v336_v23 = vrot.slane %v185_v15, %v2695_v11 }
 0x136   :  { %v2033_v32 = vrot.slane %v2025_v25, %v2701_v24  ;;  %v2040_v33 = vrot.slane %v2026_v26, %v2701_v24  ;;  %v340_v11 = vrot.slane %v185_v15, %v2703_v30 }
 0x138   :  { %v2041_v34 = vcombine.low %v2033_v32, %v2040_v33 }
 0x13a   :  { %2134 = vst [vmem:[#allocation8 + $0x28] sm:$0xff] %v2041_v34 }
 0x13b   :  { %v1563_v41 = vpop.f32.mrf.mxu0  ;;  %v1604_v42 = vpop.f32.mrf.mxu1 }
 0x13c   :  { %v1564_v43 = vadd.f32 %v1563_v41, %v292_v35  ;;  %v1605_v44 = vadd.f32 %v1604_v42, %v300_v38 }
 0x13d   :  { %v1565_v45 = vpop.f32.mrf.mxu0  ;;  %v1606_v46 = vpop.f32.mrf.mxu1 }
 0x13e   :  { %v1566_v47 = vadd.f32 %v1565_v45, %v296_v39  ;;  %v1607_v48 = vadd.f32 %v1606_v46, %v304_v40  ;;  %v348_v45 = vrot.slane %v185_v15, %v2705_v31  ;;  %v344_v46 = vrot.slane %v185_v15, %v2709_v36 }
 0x13f   :  { %v1567_v49 = vpop.f32.mrf.mxu0  ;;  %v1608_v50 = vpop.f32.mrf.mxu1 }
 0x140   :  { %v2042_v51 = vcombine.low %v1564_v43, %v1566_v47  ;;  %v2043_v52 = vcombine.low %v1605_v44, %v1607_v48  ;;  %v352_v47 = vrot.slane %v185_v15, %v2711_v37 }
 0x141   :  { %v1568_v53 = vpop.f32.mrf.mxu0  ;;  %v1609_v54 = vpop.f32.mrf.mxu1 }
 0x142   :  { %v2050_v55 = vrot.slane %v2042_v51, %v2701_v24  ;;  %v2057_v56 = vrot.slane %v2043_v52, %v2701_v24 }
 0x144   :  { %v2058_v57 = vcombine.low %v2050_v55, %v2057_v56 }
 0x146   :  { %2135 = vst [vmem:[#allocation8 + $0x30] sm:$0xff] %v2058_v57 }
 0x147   :  { %v1645_v62 = vpop.f32.mrf.mxu0  ;;  %v1686_v63 = vpop.f32.mrf.mxu1 }
 0x148   :  { %v1646_v1 = vadd.f32 %v1645_v62, %v308_v58  ;;  %v1687_v2 = vadd.f32 %v1686_v63, %v316_v59 }
 0x149   :  { %v1647_v3 = vpop.f32.mrf.mxu0  ;;  %v1688_v4 = vpop.f32.mrf.mxu1 }
 0x14a   :  { %v1648_v5 = vadd.f32 %v1647_v3, %v312_v60  ;;  %v1689_v8 = vadd.f32 %v1688_v4, %v320_v61  ;;  %v186_v61 = vld [vmem:[#allocation7 + $0x28] sm:$0x3] }
 0x14b   :  { %v1649_v10 = vpop.f32.mrf.mxu0  ;;  %v1690_v0 = vpop.f32.mrf.mxu1  ;;  %v356_v62 = vrot.slane %v186_v61, %v2689_v6  ;;  %v360_v63 = vrot.slane %v186_v61, %v2693_v9 }
 0x14c   :  { %v2059_v12 = vcombine.low %v1646_v1, %v1648_v5  ;;  %v2060_v13 = vcombine.low %v1687_v2, %v1689_v8 }
 0x14d   :  { %v1650_v14 = vpop.f32.mrf.mxu0  ;;  %v1691_v16 = vpop.f32.mrf.mxu1 }
 0x14e   :  { %v2067_v17 = vrot.slane %v2059_v12, %v2701_v24  ;;  %v2074_v18 = vrot.slane %v2060_v13, %v2701_v24 }
 0x150   :  { %v2075_v19 = vcombine.low %v2067_v17, %v2074_v18 }
 0x152   :  { %2136 = vst [vmem:[#allocation8 + $0x38] sm:$0xff] %v2075_v19 }
 0x153   :  { %v1727_v25 = vpop.f32.mrf.mxu0  ;;  %v1768_v26 = vpop.f32.mrf.mxu1 }
 0x154   :  { %v1728_v27 = vadd.f32 %v1727_v25, %v324_v20  ;;  %v1769_v28 = vadd.f32 %v1768_v26, %v332_v21 }
 0x155   :  { %v1729_v29 = vpop.f32.mrf.mxu0  ;;  %v1770_v32 = vpop.f32.mrf.mxu1 }
 0x156   :  { %v1730_v33 = vadd.f32 %v1729_v29, %v328_v22  ;;  %v1771_v34 = vadd.f32 %v1770_v32, %v336_v23 }
 0x157   :  { %v1731_v35 = vpop.f32.mrf.mxu0  ;;  %v1772_v38 = vpop.f32.mrf.mxu1 }
 0x158   :  { %v2076_v39 = vcombine.low %v1728_v27, %v1730_v33  ;;  %v2077_v40 = vcombine.low %v1769_v28, %v1771_v34 }
 0x159   :  { %v1732_v41 = vpop.f32.mrf.mxu0  ;;  %v1773_v42 = vpop.f32.mrf.mxu1 }
 0x15a   :  { %v2084_v7 = vrot.slane %v2076_v39, %v2701_v24  ;;  %v2091_v43 = vrot.slane %v2077_v40, %v2701_v24 }
 0x15c   :  { %v2092_v44 = vcombine.low %v2084_v7, %v2091_v43 }
 0x15e   :  { %2137 = vst [vmem:[#allocation8 + $0x40] sm:$0xff] %v2092_v44 }
 0x15f   :  { %v1809_v48 = vpop.f32.mrf.mxu0  ;;  %v1850_v49 = vpop.f32.mrf.mxu1 }
 0x160   :  { %v1810_v50 = vadd.f32 %v1809_v48, %v340_v11  ;;  %v1851_v51 = vadd.f32 %v1850_v49, %v348_v45 }
 0x161   :  { %v1811_v52 = vpop.f32.mrf.mxu0  ;;  %v1852_v53 = vpop.f32.mrf.mxu1 }
 0x162   :  { %v1812_v54 = vadd.f32 %v1811_v52, %v344_v46  ;;  %v1853_v55 = vadd.f32 %v1852_v53, %v352_v47 }
 0x163   :  { %v1813_v56 = vpop.f32.mrf.mxu0  ;;  %v1854_v57 = vpop.f32.mrf.mxu1 }
 0x164   :  { %v2093_v58 = vcombine.low %v1810_v50, %v1812_v54  ;;  %v2094_v59 = vcombine.low %v1851_v51, %v1853_v55 }
 0x165   :  { %v1814_v30 = vpop.f32.mrf.mxu0  ;;  %v1855_v60 = vpop.f32.mrf.mxu1 }
 0x166   :  { %v2101_v31 = vrot.slane %v2093_v58, %v2701_v24  ;;  %v2108_v36 = vrot.slane %v2094_v59, %v2701_v24 }
 0x168   :  { %v2109_v37 = vcombine.low %v2101_v31, %v2108_v36 }
 0x16a   :  { %2138 = vst [vmem:[#allocation8 + $0x48] sm:$0xff] %v2109_v37 }
 0x16b   :  { %v1891_v1 = vpop.f32.mrf.mxu0 }
 0x16c   :  { %v1892_v3 = vadd.f32 %v1891_v1, %v356_v62 }
 0x16d   :  { %v1893_v2 = vpop.f32.mrf.mxu0 }
 0x16e   :  { %v1894_v4 = vadd.f32 %v1893_v2, %v360_v63 }
 0x16f   :  { %v1895_v5 = vpop.f32.mrf.mxu0 }
 0x170   :  { %v2110_v8 = vcombine.low %v1892_v3, %v1894_v4 }
 0x171   :  { %v1896_v10 = vpop.f32.mrf.mxu0 }
 0x172   :  { %2303 = vst.sshfl [vmem:[#allocation8 + $0x50] sm:$0x33 pattern:$0x76325410] %v2110_v8 }
 0x173   :  { %2572 = shalt.err (!%p2569_p5)
}
 0x174   :  { %2149 = dma.vmem_to_hbm [thread:$0]  %s2147_s2, 1344, %s2775_s3, [#allocation4]  }
 0x175   :  { %2585 = dma.done.wait [#allocation4], 1344  }
 0x176   :  { %2586 = vsyncadd [#allocation4], 4294965952 }
 0x177   :  { %2153 = vsyncpa [#allocation3], 1 }
 0x178   :  { %2154 = vsyncpa [#allocation6], 1 }
 0x179   :  { %2155 = vsyncpa [#allocation4], 1 }

</bundles_post_ra>
